<compile_context>
chip_gen: v5e
topology: v5e:2x2
jax: 0.10.0
libtpu: 0.0.40
codegen_flags: <defaults>
</compile_context>

<pallas_src>
import functools
import math

import jax
import jax.numpy as jnp
from jax.experimental import pallas as pl
from jax.experimental.pallas import tpu as pltpu


def _build_positional_encoding(d_model: int, max_len: int = 5000) -> jnp.ndarray:
    """Replicates the torch __init__ PE table. Returns (1, max_len, d_model) float32."""
    position = jnp.arange(0, max_len, dtype=jnp.float32)[:, None]            # (max_len, 1)
    div_term = jnp.exp(
        jnp.arange(0, d_model, 2, dtype=jnp.float32) * (-math.log(10000.0) / d_model)
    )                                                                         # (d_model/2,)
    angles = position * div_term                                              # (max_len, d_model/2)
    # interleave sin (even cols) / cos (odd cols)
    pe = jnp.stack([jnp.sin(angles), jnp.cos(angles)], axis=-1).reshape(max_len, d_model)
    return pe[None, :, :]                                                     # (1, max_len, d_model)


def _pe_dropout_kernel(seed_ref, x_ref, pe_ref, o_ref, *, p: float, rows_total: int):
    # x_ref / o_ref: (1, TL, C) tile of the (B, R, C) working view.
    # pe_ref:        (1, TL, C) tile of the (1, R, C) PE view (already in x.dtype).
    x = x_ref[...]
    y = x + pe_ref[...]

    if p > 0.0:
        _, tl, c = x_ref.shape
        l = pl.program_id(0)        # L-tile index (outer grid axis)
        b = pl.program_id(1)        # batch index (inner grid axis)

        # Global flat element index for this tile -> decorrelated, tiling-independent mask.
        li = jax.lax.broadcasted_iota(jnp.int32, (1, tl, c), 1)
        ci = jax.lax.broadcasted_iota(jnp.int32, (1, tl, c), 2)
        row = l * tl + li
        flat = (b * rows_total + row) * c + ci

        # Counter-based hash PRNG (splitmix32-style finalizer), keyed by the seed.
        h = flat.astype(jnp.uint32)
        seed_u = seed_ref[0].astype(jnp.uint32)
        h = h * jnp.uint32(0x9E3779B9) + seed_u
        h = h ^ (h >> 16)
        h = h * jnp.uint32(0x7FEB352D)
        h = h ^ (h >> 15)
        h = h * jnp.uint32(0x846CA68B)
        h = h ^ (h >> 16)

        # Integer threshold compare on 31 bits (no int->float convert per element).
        r = (h & jnp.uint32(0x7FFFFFFF)).astype(jnp.int32)
        threshold = jnp.int32(min(int(round(p * float(1 << 31))), 0x7FFFFFFF))
        keep = r >= threshold

        scale = y.dtype.type(1.0 / (1.0 - p))
        y = jnp.where(keep, y * scale, jnp.zeros_like(y))

    o_ref[...] = y


def position_embeddings_forward(x, pe_full, *, p: float, seed: int = 0):
    """x: (B, L, D).  pe_full: (1, max_len, D).  Returns dropout(x + pe[:, :L])."""
    B, L, D = x.shape
    max_len = pe_full.shape[1]
    if L > max_len:
        raise ValueError(f"sequence length {L} exceeds max_len {max_len}")

    # Glue: slice PE to seq len and pre-cast to the activation dtype.
    pe = pe_full[:, :L, :].astype(x.dtype)

    # Lane-dense working view: fold (L, D) into rows of 128 lanes when D is not
    # already a multiple of 128 (elementwise op, so the reshape is pure layout).
    if D % 128 == 0:
        R, C = L, D
        xw, pew = x, pe
    elif (L * D) % 128 == 0:
        C = 128
        R = (L * D) // 128
        xw = x.reshape(B, R, C)
        pew = pe.reshape(1, R, C)
    else:
        R, C = L, D        # fallback: masked partial stores, still correct
        xw, pew = x, pe

    # Tile rows: multiple of 8 (or full extent if R < 8), capped at ~512 KiB / buffer
    # so double-buffered x/pe/out tiles stay well under scoped VMEM on v5e/v6e/v7x.
    itemsize = x.dtype.itemsize
    target_rows = max(8, (512 * 1024) // max(1, C * itemsize))
    if R < 8:
        tl = R
    else:
        tl = min(R - (R % 8), (target_rows // 8) * 8)
        tl = max(tl, 8)
    nt = pl.cdiv(R, tl)

    seed_arr = jnp.array([seed], dtype=jnp.int32)
    kernel = functools.partial(_pe_dropout_kernel, p=float(p), rows_total=R)

    out = pl.pallas_call(
        kernel,
        out_shape=jax.ShapeDtypeStruct((B, R, C), x.dtype),
        grid_spec=pltpu.PrefetchScalarGridSpec(
            num_scalar_prefetch=1,
            # L-tiles outer, batch inner: PE block index is constant across the inner
            # loop, so the PE tile is fetched once per L-tile instead of once per step.
            grid=(nt, B),
            in_specs=[
                pl.BlockSpec((1, tl, C), lambda l, b, seed: (b, l, 0)),   # x
                pl.BlockSpec((1, tl, C), lambda l, b, seed: (0, l, 0)),   # pe
            ],
            out_specs=pl.BlockSpec((1, tl, C), lambda l, b, seed: (b, l, 0)),
        ),
        compiler_params=pltpu.CompilerParams(
            dimension_semantics=("parallel", "parallel"),
        ),
    )(seed_arr, xw, pew)

    return out.reshape(B, L, D)


if __name__ == "__main__":
    B, L, D = 2, 8, 32
    max_len = 64
    dropout_p = 0.1

    key = jax.random.PRNGKey(0)
    x = jax.random.normal(key, (B, L, D), dtype=jnp.float32)

    pe_full = _build_positional_encoding(D, max_len)
    ref = x + pe_full[:, :L, :]

    # Eval-mode semantics (dropout disabled): exact add.
    out_eval = position_embeddings_forward(x, pe_full, p=0.0)
    jax.block_until_ready(out_eval)
    assert jnp.allclose(out_eval, ref, atol=1e-6, rtol=1e-6), "PE add mismatch"

    # Training-mode run with in-kernel dropout.
    # TODO(synk): dropout mask comes from an in-kernel counter-based hash PRNG; it
    # cannot bit-match torch.nn.Dropout's RNG stream (only its distribution/scaling).
    out_train = position_embeddings_forward(x, pe_full, p=dropout_p, seed=123)
    jax.block_until_ready(out_train)
    assert out_train.shape == (B, L, D)

    # Every element is either dropped (0) or scaled by 1/(1-p).
    expected = ref / (1.0 - dropout_p)
    structure_ok = jnp.all(jnp.isclose(out_train, expected, atol=1e-5) | (out_train == 0))
    assert bool(structure_ok), "dropout output structure mismatch"
    n_drop = int(jnp.sum(out_train == 0))
    assert 0 < n_drop < out_train.size, "dropout mask degenerate"

    print("KERNEL_OK")
</pallas_src>

<mosaic_0001>
module attributes {stable_mosaic.version = 11 : i64} {
  func.func @_pe_dropout_kernel(%arg0: i32, %arg1: i32, %arg2: memref<1xi32, #tpu.memory_space<smem>>, %arg3: memref<1x2x128xf32, #tpu.memory_space<vmem>>, %arg4: memref<1x2x128xf32, #tpu.memory_space<vmem>>, %arg5: memref<1x2x128xf32, #tpu.memory_space<vmem>>) attributes {dimension_semantics = [#tpu.dimension_semantics<parallel>, #tpu.dimension_semantics<parallel>], iteration_bounds = array<i64: 1, 2>, scalar_prefetch = 1 : i64, scratch_operands = 0 : i64, tpu.core_type = #tpu.core_type<tc>, window_params = [{transform_indices = @transform_0, window_bounds = array<i64: 1, 2, 128>}, {transform_indices = @transform_1, window_bounds = array<i64: 1, 2, 128>}, {transform_indices = @transform_2, window_bounds = array<i64: 1, 2, 128>}]} {
    %c0 = arith.constant 0 : index
    %c0_0 = arith.constant 0 : index
    %c0_1 = arith.constant 0 : index
    %0 = vector.load %arg3[%c0, %c0_0, %c0_1] : memref<1x2x128xf32, #tpu.memory_space<vmem>>, vector<1x2x128xf32>
    %c0_2 = arith.constant 0 : index
    %c0_3 = arith.constant 0 : index
    %c0_4 = arith.constant 0 : index
    %1 = vector.load %arg4[%c0_2, %c0_3, %c0_4] : memref<1x2x128xf32, #tpu.memory_space<vmem>>, vector<1x2x128xf32>
    %2 = arith.addf %0, %1 : vector<1x2x128xf32>
    %c0_5 = arith.constant 0 : index
    %c0_6 = arith.constant 0 : index
    %c0_7 = arith.constant 0 : index
    %3 = vector.load %arg5[%c0_5, %c0_6, %c0_7] : memref<1x2x128xf32, #tpu.memory_space<vmem>>, vector<1x2x128xf32>
    tpu.vector_store %arg5[%c0_5, %c0_6, %c0_7], %2 {strides = array<i32>} : memref<1x2x128xf32, #tpu.memory_space<vmem>>, vector<1x2x128xf32>,
    return
  }
  func.func @transform_0(%arg0: i32, %arg1: i32, %arg2: memref<1xi32, #tpu.memory_space<smem>>) -> (i32, i32, i32) {
    %c0_i32 = arith.constant 0 : i32
    %c0_i32_0 = arith.constant 0 : i32
    return %arg1, %arg0, %c0_i32 : i32, i32, i32
  }
  func.func @transform_1(%arg0: i32, %arg1: i32, %arg2: memref<1xi32, #tpu.memory_space<smem>>) -> (i32, i32, i32) {
    %c0_i32 = arith.constant 0 : i32
    %c0_i32_0 = arith.constant 0 : i32
    %c0_i32_1 = arith.constant 0 : i32
    return %c0_i32, %arg0, %c0_i32_0 : i32, i32, i32
  }
  func.func @transform_2(%arg0: i32, %arg1: i32, %arg2: memref<1xi32, #tpu.memory_space<smem>>) -> (i32, i32, i32) {
    %c0_i32 = arith.constant 0 : i32
    %c0_i32_0 = arith.constant 0 : i32
    return %arg1, %arg0, %c0_i32 : i32, i32, i32
  }
}

</mosaic_0001>

<bundles_post_ra>
// kernel: tpu_custom_call.1
= control target key start
LH: loop header
LB: loop body
LE: loop exit
PB: predicated region body
PF: predicated region fallthrough
CT: control target
= control target key end

     0   :  { %9 = vsyncpa [#allocation5], 0  ;;  %s646_s0 = inlined_call_operand.<no memory space> [shape: s32[1], index: 0, kind: input, shape index: {}]   ;;  %s647_s1 = inlined_call_operand.hbm [shape: f32[2,2,128], index: 1, kind: input, shape index: {}]   ;;  %s648_s2 = inlined_call_operand.vmem [shape: f32[1,2,128], index: 2, kind: input, shape index: {}]   ;;  %s649_s3 = inlined_call_operand.hbm [shape: f32[2,2,128], index: 3, kind: output, shape index: {}]  }
   0x1   :  { %11 = vsyncpa [#allocation5 + $0x1], 0 }
   0x2   :  { %12 = vsyncpa [#allocation6], 0 }
   0x3   :  { %14 = vsyncpa [#allocation6 + $0x1], 0  ;;  %s523_s12 = smov 0   ;;  %s525_s13 = smov 0  }
   0x4   :  { %s527_s14 = smov 0   ;;  %s529_s0 = smov 0  }
   0x5   :  { %s531_s15 = smov 0   ;;  %s533_s16 = smov 0  }
   0x6 LB: > { %s313_s17 = sadd.s32 4294967295, %s501_s16   ;;  %s314_s18 = sadd.s32 4294967294, %s501_s16   ;;  %s501_s16 = sphi %s533_s16, %s20_s16   ;;  %s497_s15 = sphi %s531_s15, %s658_s15   ;;  %s493_s0 = sphi %s529_s0, %s657_s0   ;;  %s489_s14 = sphi %s527_s14, %s656_s14   ;;  %s485_s13 = sphi %s525_s13, %s655_s13   ;;  %s481_s12 = sphi %s523_s12, %s654_s12  }
   0x7   : > { %s29_s19 = sadd.s32 1, %s497_s15  ;;  %s41_s20 = sadd.s32 1, %s489_s14 }
   0x8   : > { %p30_p0 = scmp.ge.s32.totalorder %s29_s19, 2  ;;  %p48_p1 = scmp.ne.s32.totalorder %s489_s14, %s485_s13 }
   0x9   : > { %p49_p2 = scmp.eq.s32.totalorder %s501_s16, 0  ;;  %p54_p3 = scmp.ne.s32.totalorder %s485_s13, %s481_s12 }
   0xa   : > { %s660_s19 = smov (%p30_p0, %s29_s19), 0  ;;  %p55_p5 = scmp.eq.s32.totalorder %s313_s17, 0 }
   0xb   : > { %p564_p4 = por %p49_p2, %p48_p1  ;;  %s36_s22 = ssub.s32 %s497_s15, %s660_s19 }
   0xc   : > { %p106_p6 = scmp.eq.s32.totalorder %s313_s17, 1  ;;  %p39_p7 = scmp.eq.s32.totalorder %s36_s22, 0 }
   0xd   : > { %p570_p8 = por %p55_p5, %p54_p3  ;;  %p112_p10 = scmp.eq.s32.totalorder %s314_s18, 1 }
   0xe   : > { %p574_p9 = por %p106_p6, %p48_p1  ;;  %p317_p12 = scmp.ge.s32.totalorder %s501_s16, 2 }
   0xf   : > { %s579_s25 = scalar_select %p39_p7, %s489_s14, %s41_s20  }
  0x10   : > { %p581_p11 = por %p112_p10, %p54_p3  ;;  %p339_p13 = scmp.lt.s32.totalorder %s501_s16, 2 }
  0x11   : > { %s139_s27 = sand.u32 1, %s489_s14   ;;  %s319_s29 = sshll.u32 %s497_s15, 1 }
  0x12   : > { %s318_s28 = sshll.u32 %s139_s27, 1  ;;  %s148_s5 = scalar_lea.hbm %s647_s1, %s319_s29 }
  0x13   : > { %s143_s6 = scalar_lea.vmem [#allocation4], %s318_s28  ;;  %s150_s8 = sshll.u32 %s148_s5, 4  ;;  %s151_s8 = int_to_ptr.hbm [resolvable:$true] %s150_s8 }
  0x14   : > { %s152_s7 = sshll.u32 %s143_s6, 4  ;;  %p332_p0 = pnand %p339_p13, %p564_p4  ;;  %s153_s7 = int_to_ptr.vmem [resolvable:$true] %s152_s7 }
  0x15   : > { %p320_p1 = scmp.ge.s32.totalorder %s501_s16, 1  ;;  %p157_p2 = scmp.lt.s32.totalorder %s501_s16, 3 }
  0x16   : > { %s140_s9 = scalar_lea.sflag [#allocation5], %s139_s27 }
  0x17   : > { %334 = dma.hbm_to_vmem [thread:$0]  (!%p332_p0), %s151_s8, 32, %s153_s7, %s140_s9  }
  0x18   : > { %p158_p3 = pnand %p320_p1, %p157_p2 }
  0x19   : > { %s597_s10 = sand.u32 (!%p158_p3), 1, %s485_s13  }
  0x1a   : > { %161 = sbr.rel (%p158_p3) target bundleno = 47 (0x2f), region = 28  ;;  %s321_s11 = sshll.u32 (!%p158_p3), %s597_s10, 1 }
  0x1b   : > { %s164_s17 = scalar_lea.sflag (!%p158_p3), [#allocation5], %s597_s10  ;;  %s167_s18 = scalar_lea.vmem (!%p158_p3), [#allocation4], %s321_s11 }
  0x1f   : > { %472 = dma.done.wait (%p570_p8), %s164_s17, 32  }
  0x20   : > { %474 = vsyncadd (%p570_p8), %s164_s17, 4294967264  ;;  %s324_s20 = sshll.u32 %s493_s0, 1  ;;  %s192_s28 = scalar_lea.vmem [#allocation7], %s321_s11  ;;  %v197_v0 = vld [vmem:[%s167_s18] sm:$0x3] }
  0x21   : > { %s213_s27 = scalar_lea.hbm %s649_s3, %s324_s20  ;;  %s215_s29 = sshll.u32 %s192_s28, 4  ;;  %v198_v1 = vld [vmem:[%s648_s2] sm:$0x3]  ;;  %s216_s29 = int_to_ptr.vmem [resolvable:$true] %s215_s29 }
  0x22   : > { %s217_s30 = sshll.u32 %s213_s27, 4  ;;  %v199_v2 = vadd.f32 %v198_v1, %v197_v0  ;;  %s202_s23 = scalar_lea.sflag [#allocation6], %s597_s10  ;;  %s218_s30 = int_to_ptr.hbm [resolvable:$true] %s217_s30 }
  0x23   : > { %s433_s6 = sshra.s32 %s218_s30, 4  ;;  %s439_s9 = scalar_lea.hbm %s649_s3, 4  ;;  %s434_s6 = int_to_ptr.hbm [resolvable:$true] %s433_s6 }
  0x24   : > { %200 = vst [vmem:[%s192_s28] sm:$0x3] %v199_v2  ;;  %s435_s0 = scalar_lea.hbm %s434_s6, 2  ;;  %p440_p7 = scmp.lt.s32.totalorder %s434_s6, %s649_s3 }
  0x25   : > { %p436_p4 = scmp.ne.s32.totalorder %s434_s6, %s435_s0  ;;  %p441_p8 = scmp.lt.s32.totalorder %s439_s9, %s435_s0 }
  0x27   : > { %p437_p5 = pnand %p436_p4, %p574_p9  ;;  %p442_p10 = por %p441_p8, %p440_p7 }
  0x29   : > { %p438_p6 = pneg %p437_p5 }
  0x2b   : > { %p443_p13 = pnand %p442_p10, %p438_p6 }
  0x2d   : > { %446 = shalt.err (!%p443_p13)
}
  0x2e   : > { %329 = dma.vmem_to_hbm [thread:$0]  (%p574_p9), %s216_s29, 32, %s218_s30, %s202_s23  }
  0x2f PF: > { %s229_s10 = sand.u32 1, %s481_s12   ;;  %p336_p0 = pnand %p317_p12, %p581_p11 }
  0x30   : > { %s230_s18 = scalar_lea.sflag [#allocation6], %s229_s10 }
  0x31   : > { %p337_p1 = pneg %p336_p0 }
  0x33   : > { %476 = dma.done.wait (%p337_p1), %s230_s18, 32  }
  0x34   : > { %478 = vsyncadd (%p337_p1), %s230_s18, 4294967264  ;;  %s20_s16 = sadd.s32 1, %s501_s16   ;;  %s654_s12 = smov %s485_s13 }
  0x35   : > { %p17_p2 = scmp.ge.s32.totalorder %s20_s16, 4   ;;  %s655_s13 = smov %s489_s14 }
  0x36   : > { %s656_s14 = smov %s579_s25  ;;  %s657_s0 = smov %s497_s15 }
  0x37   : > { %s658_s15 = smov %s660_s19  ;;  %19 = sbr.rel (!%p17_p2) target bundleno = 6 (0x6), region = 76 }
  0x3c   :  { %236 = vsyncpa [#allocation5], 1 }
  0x3d   :  { %238 = vsyncpa [#allocation5 + $0x1], 1 }
  0x3e   :  { %239 = vsyncpa [#allocation6], 1 }
  0x3f   :  { %241 = vsyncpa [#allocation6 + $0x1], 1 }

</bundles_post_ra>
